<compile_context>
chip_gen: v6e
topology: v6e:2x2x1
jax: 0.10.0
libtpu: 0.0.40
codegen_flags: <defaults>
</compile_context>

<pallas_src>
import functools

import jax
import jax.numpy as jnp
from jax.experimental import pallas as pl
from jax.experimental.pallas import tpu as pltpu

LANE = 128
SUBLANE = 8


def _round_up(x, m):
    return (x + m - 1) // m * m


def mdn_kernel(x_ref, w1_ref, b1_ref, w2_ref, b2_ref, wh_ref, bh_ref,
               out_ref, *, n_components, seg):
    cd = w1_ref.dtype

    x = x_ref[...]

    # h = relu(fc1(x)); accumulate in f32, keep matmul inputs in compute dtype.
    h = jnp.dot(x, w1_ref[...], preferred_element_type=jnp.float32) + b1_ref[...]
    h = jnp.maximum(h, 0.0).astype(cd)

    # h = relu(fc2(h))
    h = jnp.dot(h, w2_ref[...], preferred_element_type=jnp.float32) + b2_ref[...]
    h = jnp.maximum(h, 0.0).astype(cd)

    # Fused head projection into a single lane-dense slab:
    #   [ pi(0:n) | mu(seg:seg+n) | sigma(2*seg:2*seg+n) | zero-pad ]
    heads = jnp.dot(h, wh_ref[...], preferred_element_type=jnp.float32) + bh_ref[...]

    lane = jax.lax.broadcasted_iota(jnp.int32, heads.shape, dimension=1)
    pi_mask = lane < n_components
    mu_mask = (lane >= seg) & (lane < seg + n_components)
    sg_mask = (lane >= 2 * seg) & (lane < 2 * seg + n_components)

    # Softmax over the pi segment only (masked lanes -> -inf -> exp -> 0).
    logits = jnp.where(pi_mask, heads, -jnp.inf)
    m = jnp.max(logits, axis=-1, keepdims=True)
    e = jnp.exp(logits - m)
    denom = jnp.sum(e, axis=-1, keepdims=True)
    pi = e / denom  # exact divide: pi rows sum to 1 (safe if fed to an NLL loss)

    # sigma = softplus(heads) + 1e-5  (numerically stable softplus).
    sigma = jnp.maximum(heads, 0.0) + jnp.log1p(jnp.exp(-jnp.abs(heads))) + 1e-5

    slab = jnp.where(pi_mask, pi,
                     jnp.where(mu_mask, heads,
                               jnp.where(sg_mask, sigma, 0.0)))
    # Single unmasked, lane-dense, full-width store.
    out_ref[...] = slab.astype(out_ref.dtype)


def mdn_forward(x, params, *, tile_b=None, compute_dtype=jnp.float32,
                out_dtype=jnp.float32):
    """x: (B, in_dim); params: dict of pre-transposed weights & (1, D) biases.

    compute_dtype=jnp.bfloat16 gives MXU-peak matmuls on v5e/v6e/v7x (the
    accumulation stays f32 via preferred_element_type); out_dtype=bf16 halves
    the output writeback if downstream consumers allow it.
    """
    B, in_dim = x.shape
    hidden_dim = params["w1"].shape[1]
    n_components = params["w_pi"].shape[1]

    # Pack all three heads into one 128-lane vreg when they fit; otherwise pad
    # each head segment to a lane multiple (general fallback).
    if 3 * n_components <= LANE:
        seg = n_components
    else:
        seg = _round_up(n_components, LANE)
    n_out = _round_up(3 * seg, LANE)

    def place(dst_w, dst_b, w, b, off):
        dst_w = dst_w.at[:, off:off + n_components].set(w)
        dst_b = dst_b.at[:, off:off + n_components].set(b)
        return dst_w, dst_b

    w_heads = jnp.zeros((hidden_dim, n_out), jnp.float32)
    b_heads = jnp.zeros((1, n_out), jnp.float32)
    w_heads, b_heads = place(w_heads, b_heads, params["w_pi"], params["b_pi"], 0)
    w_heads, b_heads = place(w_heads, b_heads, params["w_mu"], params["b_mu"], seg)
    w_heads, b_heads = place(w_heads, b_heads, params["w_sigma"], params["b_sigma"], 2 * seg)

    cd = compute_dtype
    x_c = x.astype(cd)
    w1, b1 = params["w1"].astype(cd), params["b1"].astype(jnp.float32)
    w2, b2 = params["w2"].astype(cd), params["b2"].astype(jnp.float32)
    w_heads = w_heads.astype(cd)
    b_heads = b_heads.astype(jnp.float32)

    # Batch tiling: big tiles to amortize per-grid-step overhead, but keep at
    # least 2 grid steps for medium/large batches so the "parallel" axis can
    # shard across v7x's two TensorCores (no effect on v5e/v6e, 1 TC).
    if tile_b is None:
        tile_b = min(2048, _round_up(B, SUBLANE))
        if B > SUBLANE:
            tile_b = min(tile_b, _round_up(pl.cdiv(B, 2), SUBLANE))
    tile_b = max(SUBLANE, _round_up(tile_b, SUBLANE))
    b_pad = _round_up(B, tile_b)
    if b_pad != B:
        x_c = jnp.pad(x_c, ((0, b_pad - B), (0, 0)))
    grid = (b_pad // tile_b,)

    kernel = functools.partial(mdn_kernel, n_components=n_components, seg=seg)

    itemsize = jnp.dtype(cd).itemsize
    out_itemsize = jnp.dtype(out_dtype).itemsize
    vmem_bytes = (
        2 * tile_b * in_dim * itemsize                  # double-buffered x tiles
        + 2 * tile_b * n_out * out_itemsize             # double-buffered out tiles
        + (in_dim * hidden_dim + hidden_dim * hidden_dim
           + hidden_dim * n_out) * itemsize             # resident weights
        + (2 * hidden_dim + n_out) * 4                  # resident biases
    )
    # Cap well below physical VMEM (v7x has only 64 MiB/TC) for compiler headroom.
    vmem_limit = int(min(max(2 * vmem_bytes, 8 * 1024 * 1024), 48 * 1024 * 1024))

    const = lambda i: (0, 0)
    # TODO(synk): on v5e, if the output DMA is still exposed after the 128-wide
    # slab change, add pipeline_mode=pl.Buffered(3) on the x/out BlockSpecs.
    out = pl.pallas_call(
        kernel,
        out_shape=jax.ShapeDtypeStruct((b_pad, n_out), out_dtype),
        grid=grid,
        in_specs=[
            pl.BlockSpec((tile_b, in_dim), lambda i: (i, 0)),   # x: tiled over batch
            pl.BlockSpec((in_dim, hidden_dim), const),          # w1 (VMEM-resident)
            pl.BlockSpec((1, hidden_dim), const),               # b1
            pl.BlockSpec((hidden_dim, hidden_dim), const),      # w2 (resident)
            pl.BlockSpec((1, hidden_dim), const),               # b2
            pl.BlockSpec((hidden_dim, n_out), const),           # fused head W (resident)
            pl.BlockSpec((1, n_out), const),                    # fused head b
        ],
        out_specs=pl.BlockSpec((tile_b, n_out), lambda i: (i, 0)),
        compiler_params=pltpu.CompilerParams(
            dimension_semantics=("parallel",),
            vmem_limit_bytes=vmem_limit,
        ),
    )(x_c, w1, b1, w2, b2, w_heads, b_heads)

    pi = out[:B, 0:n_components]
    mu = out[:B, seg:seg + n_components]
    sigma = out[:B, 2 * seg:2 * seg + n_components]
    return pi, mu, sigma


def init_params(key, in_dim, hidden_dim, n_components):
    """Deterministic synthetic parameters (shapes match the nn.Linear layers)."""
    keys = jax.random.split(key, 10)

    def linear(kw, kb, fan_in, fan_out):
        # PyTorch default init: U(-1/sqrt(fan_in), 1/sqrt(fan_in))
        bound = 1.0 / jnp.sqrt(jnp.float32(fan_in))
        w = jax.random.uniform(kw, (fan_in, fan_out), jnp.float32, -bound, bound)
        b = jax.random.uniform(kb, (1, fan_out), jnp.float32, -bound, bound)
        return w, b

    w1, b1 = linear(keys[0], keys[1], in_dim, hidden_dim)
    w2, b2 = linear(keys[2], keys[3], hidden_dim, hidden_dim)
    w_pi, b_pi = linear(keys[4], keys[5], hidden_dim, n_components)
    w_mu, b_mu = linear(keys[6], keys[7], hidden_dim, n_components)
    w_sg, b_sg = linear(keys[8], keys[9], hidden_dim, n_components)
    return dict(w1=w1, b1=b1, w2=w2, b2=b2,
                w_pi=w_pi, b_pi=b_pi, w_mu=w_mu, b_mu=b_mu,
                w_sigma=w_sg, b_sigma=b_sg)


def mdn_reference(x, p):
    hp = jax.lax.Precision.HIGHEST
    h = jnp.maximum(jnp.dot(x, p["w1"], precision=hp) + p["b1"], 0.0)
    h = jnp.maximum(jnp.dot(h, p["w2"], precision=hp) + p["b2"], 0.0)
    pi = jax.nn.softmax(jnp.dot(h, p["w_pi"], precision=hp) + p["b_pi"], axis=-1)
    mu = jnp.dot(h, p["w_mu"], precision=hp) + p["b_mu"]
    sigma = jax.nn.softplus(jnp.dot(h, p["w_sigma"], precision=hp) + p["b_sigma"]) + 1e-5
    return pi, mu, sigma


def _check(x, params, **kwargs):
    pi, mu, sigma = mdn_forward(x, params, **kwargs)
    jax.block_until_ready((pi, mu, sigma))
    pi_r, mu_r, sg_r = mdn_reference(x, params)
    assert jnp.allclose(pi, pi_r, atol=2e-3, rtol=2e-3), "pi mismatch"
    assert jnp.allclose(mu, mu_r, atol=5e-3, rtol=5e-3), "mu mismatch"
    assert jnp.allclose(sigma, sg_r, atol=5e-3, rtol=5e-3), "sigma mismatch"
    # Exact divide in the kernel's softmax -> rows sum to 1 to f32 precision.
    assert jnp.allclose(jnp.sum(pi, axis=-1), 1.0, atol=1e-3), "pi rows must sum to ~1"
    return pi, mu, sigma


if __name__ == "__main__":
    in_dim, hidden_dim, n_components = 16, 32, 8

    key = jax.random.PRNGKey(0)
    kx, kp, kx2 = jax.random.split(key, 3)
    params = init_params(kp, in_dim, hidden_dim, n_components)

    # Small shape: single grid step.
    x = jax.random.normal(kx, (8, in_dim), dtype=jnp.float32)
    _check(x, params)

    # Larger / ragged batch: exercises multi-step parallel grid + batch padding.
    x2 = jax.random.normal(kx2, (200, in_dim), dtype=jnp.float32)
    _check(x2, params, tile_b=64)

    print("KERNEL_OK")
</pallas_src>

<mosaic_0001>
module attributes {stable_mosaic.version = 11 : i64} {
  func.func @mdn_kernel(%arg0: i32, %arg1: memref<8x16xf32, #tpu.memory_space<vmem>>, %arg2: memref<16x32xf32, #tpu.memory_space<vmem>>, %arg3: memref<1x32xf32, #tpu.memory_space<vmem>>, %arg4: memref<32x32xf32, #tpu.memory_space<vmem>>, %arg5: memref<1x32xf32, #tpu.memory_space<vmem>>, %arg6: memref<32x128xf32, #tpu.memory_space<vmem>>, %arg7: memref<1x128xf32, #tpu.memory_space<vmem>>, %arg8: memref<8x128xf32, #tpu.memory_space<vmem>>) attributes {dimension_semantics = [#tpu.dimension_semantics<parallel>], iteration_bounds = array<i64: 1>, scalar_prefetch = 0 : i64, scratch_operands = 0 : i64, tpu.core_type = #tpu.core_type<tc>, window_params = [{transform_indices = @transform_0, window_bounds = array<i64: 8, 16>}, {pipeline_mode = #tpu.pipeline_mode<synchronous>, transform_indices = @transform_1, window_bounds = array<i64: 16, 32>}, {pipeline_mode = #tpu.pipeline_mode<synchronous>, transform_indices = @transform_2, window_bounds = array<i64: 1, 32>}, {pipeline_mode = #tpu.pipeline_mode<synchronous>, transform_indices = @transform_3, window_bounds = array<i64: 32, 32>}, {pipeline_mode = #tpu.pipeline_mode<synchronous>, transform_indices = @transform_4, window_bounds = array<i64: 1, 32>}, {pipeline_mode = #tpu.pipeline_mode<synchronous>, transform_indices = @transform_5, window_bounds = array<i64: 32, 128>}, {pipeline_mode = #tpu.pipeline_mode<synchronous>, transform_indices = @transform_6, window_bounds = array<i64: 1, 128>}, {transform_indices = @transform_7, window_bounds = array<i64: 8, 128>}]} {
    %c0 = arith.constant 0 : index
    %c0_0 = arith.constant 0 : index
    %0 = vector.load %arg1[%c0, %c0_0] : memref<8x16xf32, #tpu.memory_space<vmem>>, vector<8x16xf32>
    %c0_1 = arith.constant 0 : index
    %c0_2 = arith.constant 0 : index
    %1 = vector.load %arg2[%c0_1, %c0_2] : memref<16x32xf32, #tpu.memory_space<vmem>>, vector<16x32xf32>
    %cst = arith.constant dense<0.000000e+00> : vector<8x32xf32>
    %2 = tpu.matmul %0, %1, %cst {dimension_numbers = #tpu.dot_dimension_numbers<[1], [0], [0], [1], [0, 0, 1, 1], [], []>} : vector<8x16xf32>, vector<16x32xf32>, vector<8x32xf32> -> vector<8x32xf32>
    %c0_3 = arith.constant 0 : index
    %c0_4 = arith.constant 0 : index
    %3 = vector.load %arg3[%c0_3, %c0_4] : memref<1x32xf32, #tpu.memory_space<vmem>>, vector<1x32xf32>
    %4 = vector.broadcast %3 : vector<1x32xf32> to vector<8x32xf32>
    %5 = arith.addf %2, %4 : vector<8x32xf32>
    %cst_5 = arith.constant 0.000000e+00 : f32
    %6 = vector.broadcast %cst_5 : f32 to vector<8x32xf32>
    %7 = arith.maximumf %5, %6 : vector<8x32xf32>
    %c0_6 = arith.constant 0 : index
    %c0_7 = arith.constant 0 : index
    %8 = vector.load %arg4[%c0_6, %c0_7] : memref<32x32xf32, #tpu.memory_space<vmem>>, vector<32x32xf32>
    %cst_8 = arith.constant dense<0.000000e+00> : vector<8x32xf32>
    %9 = tpu.matmul %7, %8, %cst_8 {dimension_numbers = #tpu.dot_dimension_numbers<[1], [0], [0], [1], [0, 0, 1, 1], [], []>} : vector<8x32xf32>, vector<32x32xf32>, vector<8x32xf32> -> vector<8x32xf32>
    %c0_9 = arith.constant 0 : index
    %c0_10 = arith.constant 0 : index
    %10 = vector.load %arg5[%c0_9, %c0_10] : memref<1x32xf32, #tpu.memory_space<vmem>>, vector<1x32xf32>
    %11 = vector.broadcast %10 : vector<1x32xf32> to vector<8x32xf32>
    %12 = arith.addf %9, %11 : vector<8x32xf32>
    %cst_11 = arith.constant 0.000000e+00 : f32
    %13 = vector.broadcast %cst_11 : f32 to vector<8x32xf32>
    %14 = arith.maximumf %12, %13 : vector<8x32xf32>
    %c0_12 = arith.constant 0 : index
    %c0_13 = arith.constant 0 : index
    %15 = vector.load %arg6[%c0_12, %c0_13] : memref<32x128xf32, #tpu.memory_space<vmem>>, vector<32x128xf32>
    %cst_14 = arith.constant dense<0.000000e+00> : vector<8x128xf32>
    %16 = tpu.matmul %14, %15, %cst_14 {dimension_numbers = #tpu.dot_dimension_numbers<[1], [0], [0], [1], [0, 0, 1, 1], [], []>} : vector<8x32xf32>, vector<32x128xf32>, vector<8x128xf32> -> vector<8x128xf32>
    %c0_15 = arith.constant 0 : index
    %c0_16 = arith.constant 0 : index
    %17 = vector.load %arg7[%c0_15, %c0_16] : memref<1x128xf32, #tpu.memory_space<vmem>>, vector<1x128xf32>
    %18 = vector.broadcast %17 : vector<1x128xf32> to vector<8x128xf32>
    %19 = arith.addf %16, %18 : vector<8x128xf32>
    %20 = tpu.iota {dimensions = array<i32: 1>} : vector<8x128xi32>
    %c8_i32 = arith.constant 8 : i32
    %21 = vector.broadcast %c8_i32 : i32 to vector<8x128xi32>
    %22 = arith.cmpi slt, %20, %21 : vector<8x128xi32>
    %c8_i32_17 = arith.constant 8 : i32
    %23 = vector.broadcast %c8_i32_17 : i32 to vector<8x128xi32>
    %24 = arith.cmpi sge, %20, %23 : vector<8x128xi32>
    %c16_i32 = arith.constant 16 : i32
    %25 = vector.broadcast %c16_i32 : i32 to vector<8x128xi32>
    %26 = arith.cmpi slt, %20, %25 : vector<8x128xi32>
    %27 = arith.andi %24, %26 : vector<8x128xi1>
    %c16_i32_18 = arith.constant 16 : i32
    %28 = vector.broadcast %c16_i32_18 : i32 to vector<8x128xi32>
    %29 = arith.cmpi sge, %20, %28 : vector<8x128xi32>
    %c24_i32 = arith.constant 24 : i32
    %30 = vector.broadcast %c24_i32 : i32 to vector<8x128xi32>
    %31 = arith.cmpi slt, %20, %30 : vector<8x128xi32>
    %32 = arith.andi %29, %31 : vector<8x128xi1>
    %cst_19 = arith.constant 0xFF800000 : f32
    %33 = vector.broadcast %cst_19 : f32 to vector<8x128xf32>
    %34 = arith.select %22, %19, %33 : vector<8x128xi1>, vector<8x128xf32>
    %cst_20 = arith.constant dense<0xFF800000> : vector<8xf32>
    %35 = vector.multi_reduction <maximumf>, %34, %cst_20 [1] : vector<8x128xf32> to vector<8xf32>
    %36 = vector.shape_cast %35 : vector<8xf32> to vector<8x1xf32>
    %37 = vector.broadcast %36 : vector<8x1xf32> to vector<8x128xf32>
    %38 = arith.subf %34, %37 : vector<8x128xf32>
    %39 = math.exp %38 : vector<8x128xf32>
    %cst_21 = arith.constant dense<0.000000e+00> : vector<8xf32>
    %40 = vector.multi_reduction <add>, %39, %cst_21 [1] : vector<8x128xf32> to vector<8xf32>
    %41 = vector.shape_cast %40 : vector<8xf32> to vector<8x1xf32>
    %42 = vector.broadcast %41 : vector<8x1xf32> to vector<8x128xf32>
    %43 = arith.divf %39, %42 : vector<8x128xf32>
    %cst_22 = arith.constant 0.000000e+00 : f32
    %44 = vector.broadcast %cst_22 : f32 to vector<8x128xf32>
    %45 = arith.maximumf %19, %44 : vector<8x128xf32>
    %46 = math.absf %19 : vector<8x128xf32>
    %cst_23 = arith.constant 0.000000e+00 : f32
    %47 = vector.broadcast %cst_23 : f32 to vector<8x128xf32>
    %48 = arith.subf %47, %46 : vector<8x128xf32>
    %49 = math.exp %48 : vector<8x128xf32>
    %50 = math.log1p %49 : vector<8x128xf32>
    %51 = arith.addf %45, %50 : vector<8x128xf32>
    %cst_24 = arith.constant 9.99999974E-6 : f32
    %52 = vector.broadcast %cst_24 : f32 to vector<8x128xf32>
    %53 = arith.addf %51, %52 : vector<8x128xf32>
    %cst_25 = arith.constant 0.000000e+00 : f32
    %54 = vector.broadcast %cst_25 : f32 to vector<8x128xf32>
    %55 = arith.select %32, %53, %54 : vector<8x128xi1>, vector<8x128xf32>
    %56 = arith.select %27, %19, %55 : vector<8x128xi1>, vector<8x128xf32>
    %57 = arith.select %22, %43, %56 : vector<8x128xi1>, vector<8x128xf32>
    %c0_26 = arith.constant 0 : index
    %c0_27 = arith.constant 0 : index
    %58 = vector.load %arg8[%c0_26, %c0_27] : memref<8x128xf32, #tpu.memory_space<vmem>>, vector<8x128xf32>
    tpu.vector_store %arg8[%c0_26, %c0_27], %57 {strides = array<i32>} : memref<8x128xf32, #tpu.memory_space<vmem>>, vector<8x128xf32>,
    return
  }
  func.func @transform_0(%arg0: i32) -> (i32, i32) {
    %c0_i32 = arith.constant 0 : i32
    %c0_i32_0 = arith.constant 0 : i32
    return %arg0, %c0_i32 : i32, i32
  }
  func.func @transform_1(%arg0: i32) -> (i32, i32) {
    %c0_i32 = arith.constant 0 : i32
    %c0_i32_0 = arith.constant 0 : i32
    %c0_i32_1 = arith.constant 0 : i32
    return %c0_i32, %c0_i32_0 : i32, i32
  }
  func.func @transform_2(%arg0: i32) -> (i32, i32) {
    %c0_i32 = arith.constant 0 : i32
    %c0_i32_0 = arith.constant 0 : i32
    %c0_i32_1 = arith.constant 0 : i32
    return %c0_i32, %c0_i32_0 : i32, i32
  }
  func.func @transform_3(%arg0: i32) -> (i32, i32) {
    %c0_i32 = arith.constant 0 : i32
    %c0_i32_0 = arith.constant 0 : i32
    %c0_i32_1 = arith.constant 0 : i32
    return %c0_i32, %c0_i32_0 : i32, i32
  }
  func.func @transform_4(%arg0: i32) -> (i32, i32) {
    %c0_i32 = arith.constant 0 : i32
    %c0_i32_0 = arith.constant 0 : i32
    %c0_i32_1 = arith.constant 0 : i32
    return %c0_i32, %c0_i32_0 : i32, i32
  }
  func.func @transform_5(%arg0: i32) -> (i32, i32) {
    %c0_i32 = arith.constant 0 : i32
    %c0_i32_0 = arith.constant 0 : i32
    %c0_i32_1 = arith.constant 0 : i32
    return %c0_i32, %c0_i32_0 : i32, i32
  }
  func.func @transform_6(%arg0: i32) -> (i32, i32) {
    %c0_i32 = arith.constant 0 : i32
    %c0_i32_0 = arith.constant 0 : i32
    %c0_i32_1 = arith.constant 0 : i32
    return %c0_i32, %c0_i32_0 : i32, i32
  }
  func.func @transform_7(%arg0: i32) -> (i32, i32) {
    %c0_i32 = arith.constant 0 : i32
    %c0_i32_0 = arith.constant 0 : i32
    return %arg0, %c0_i32 : i32, i32
  }
}

</mosaic_0001>

<bundles_post_ra>
// kernel: tpu_custom_call.1
= control target key start
LH: loop header
LB: loop body
LE: loop exit
PB: predicated region body
PF: predicated region fallthrough
CT: control target
= control target key end

     0   :  { %12 = vsyncpa [#allocation3], 0  ;;  %s653_s0 = inlined_call_operand.hbm [shape: f32[8,16], index: 0, kind: input, shape index: {}]   ;;  %s654_s1 = inlined_call_operand.hbm [shape: f32[16,32], index: 1, kind: input, shape index: {}]   ;;  %s655_s2 = inlined_call_operand.vmem [shape: f32[1,32], index: 2, kind: input, shape index: {}]   ;;  %s656_s3 = inlined_call_operand.hbm [shape: f32[32,32], index: 3, kind: input, shape index: {}]   ;;  %s657_s4 = inlined_call_operand.vmem [shape: f32[1,32], index: 4, kind: input, shape index: {}]   ;;  %s658_s5 = inlined_call_operand.hbm [shape: f32[32,128], index: 5, kind: input, shape index: {}]   ;;  %s659_s6 = inlined_call_operand.vmem [shape: f32[1,128], index: 6, kind: input, shape index: {}]   ;;  %s660_s7 = inlined_call_operand.hbm [shape: f32[8,128], index: 7, kind: output, shape index: {}]  }
   0x1   :  { %13 = vsyncpa [#allocation6], 0 }
   0x2   :  { %14 = vsyncpa [#allocation9], 0 }
   0x3   :  { %15 = vsyncpa [#allocation4], 0  ;;  %s564_s24 = smov [#allocation5]  }
   0x4   :  { %s31_s25 = sshll.u32 %s564_s24, 4  ;;  %s32_s25 = int_to_ptr.vmem [resolvable:$true] %s31_s25 }
   0x5   :  { %s464_s26 = scalar_lea.vmem %s32_s25, 256  ;;  %p469_p1 = scmp.lt.s32.totalorder %s32_s25, %s32_s25 }
   0x6   :  { %p465_p0 = scmp.ne.s32.totalorder %s32_s25, %s464_s26  ;;  %p470_p2 = scmp.lt.s32.totalorder %s464_s26, %s464_s26 }
   0x8   :  { %p471_p3 = por %p470_p2, %p469_p1 }
   0xa   :  { %p472_p4 = pnand %p471_p3, %p465_p0 }
   0xc   :  { %475 = shalt.err (!%p472_p4)
}
   0xd   :  { %s565_s27 = smov 128   ;;  %s566_s28 = smov 8  }
   0xe   :  { %37 = dma.hbm_to_vmem [thread:$0]  %s654_s1, 256, %s32_s25, [#allocation6], %s565_s27, %s565_s27, %s566_s28  }
   0xf   :  { %s567_s8 = smov [#allocation2]   ;;  %s568_s10 = smov [#allocation7]  }
  0x10   :  { %s22_s9 = sshll.u32 %s567_s8, 4  ;;  %s45_s11 = sshll.u32 %s568_s10, 4  ;;  %s23_s9 = int_to_ptr.vmem [resolvable:$true] %s22_s9  ;;  %s46_s11 = int_to_ptr.vmem [resolvable:$true] %s45_s11 }
  0x11   :  { %s484_s12 = scalar_lea.vmem %s23_s9, 128  ;;  %p489_p6 = scmp.lt.s32.totalorder %s23_s9, %s23_s9 }
  0x12   :  { %p485_p5 = scmp.ne.s32.totalorder %s23_s9, %s484_s12  ;;  %p490_p7 = scmp.lt.s32.totalorder %s484_s12, %s484_s12 }
  0x14   :  { %p491_p8 = por %p490_p7, %p489_p6 }
  0x16   :  { %p492_p9 = pnand %p491_p8, %p485_p5 }
  0x18   :  { %495 = shalt.err (!%p492_p9)
}
  0x19   :  { %25 = dma.hbm_to_vmem [thread:$0]  %s653_s0, 128, %s23_s9, [#allocation3]  }
  0x1a   :  { %s504_s15 = scalar_lea.vmem %s46_s11, 512  ;;  %p509_p11 = scmp.lt.s32.totalorder %s46_s11, %s46_s11 }
  0x1b   :  { %p505_p10 = scmp.ne.s32.totalorder %s46_s11, %s504_s15  ;;  %p510_p12 = scmp.lt.s32.totalorder %s504_s15, %s504_s15 }
  0x1d   :  { %p511_p13 = por %p510_p12, %p509_p11 }
  0x1f   :  { %p512_p0 = pnand %p511_p13, %p505_p10 }
  0x21   :  { %515 = shalt.err (!%p512_p0)
}
  0x22   :  { %51 = dma.hbm_to_vmem [thread:$0]  %s656_s3, 512, %s46_s11, [#allocation6], %s565_s27, %s565_s27, %s566_s28  }
  0x23   :  { %s569_s17 = smov [#allocation8]  }
  0x24   :  { %s59_s18 = sshll.u32 %s569_s17, 4  ;;  %s60_s18 = int_to_ptr.vmem [resolvable:$true] %s59_s18 }
  0x25   :  { %s524_s19 = scalar_lea.vmem %s60_s18, 512  ;;  %p529_p2 = scmp.lt.s32.totalorder %s60_s18, %s60_s18 }
  0x26   :  { %p525_p1 = scmp.ne.s32.totalorder %s60_s18, %s524_s19  ;;  %p530_p3 = scmp.lt.s32.totalorder %s524_s19, %s524_s19 }
  0x28   :  { %p531_p4 = por %p530_p3, %p529_p2 }
  0x2a   :  { %p532_p5 = pnand %p531_p4, %p525_p1 }
  0x2c   :  { %535 = shalt.err (!%p532_p5)
}
  0x2d   :  { %65 = dma.hbm_to_vmem [thread:$0]  %s658_s5, 512, %s60_s18, [#allocation9], %s565_s27, %s565_s27, %s566_s28  }
  0x2e   :  { %556 = dma.done.wait [#allocation3], 128  }
  0x2f   :  { %557 = vsyncadd [#allocation3], 4294967168 }
  0x30   :  { %558 = dma.done.wait [#allocation6], 768  }
  0x31   :  { %559 = vsyncadd [#allocation6], 4294966528 }
  0x32   :  { %560 = dma.done.wait [#allocation9], 512  }
  0x33   :  { %561 = vsyncadd [#allocation9], 4294966784  ;;  %v570_v0 = vmov 0.0   ;;  %vm571_vm0 = vmmov 0   ;;  %v82_v1 = vld [vmem:[#allocation5 + $0x8] sm:$0xff]  ;;  %v81_v2 = vld [vmem:[#allocation5] sm:$0xff]  ;;  %v335_v22 = vlaneseq }
  0x34   :  { %410 = vmatprep.subr.mxu0 %v570_v0  ;;  %414 = vmatprep.mubr.msk.f32.mxu0 %vm571_vm0, %v570_v0  ;;  %v80_v3 = vld [vmem:[#allocation2] sm:$0xff]  ;;  %vm90_vm1 = vcmask 130048   ;;  %v168_v4 = vld [vmem:[#allocation7 + $0x18] sm:$0xff]  ;;  %v167_v5 = vld [vmem:[#allocation7 + $0x10] sm:$0xff]  ;;  %vm176_vm2 = vcmask 261120  }
  0x35   :  { %417 = vmatprep.subr.mxu1 %v570_v0  ;;  %425 = vmatprep.mubr.msk.f32.mxu1 %vm571_vm0, %v570_v0  ;;  %v166_v6 = vld [vmem:[#allocation7 + $0x8] sm:$0xff]  ;;  %v165_v7 = vld [vmem:[#allocation7] sm:$0xff]  ;;  %v254_v8 = vld [vmem:[#allocation8 + $0x18] sm:$0xff]  ;;  %v336_v23 = vand.u32 127, %v335_v22 }
  0x36   :  { %411 = vmatpush3.msra.mxu0 %v82_v1  ;;  %418 = vmatpush3.msra.mxu1 %v168_v4  ;;  %v391_v9 = vld [vmem:[%s655_s2] ss:$0 sm:$0xff]  ;;  %v253_v14 = vld [vmem:[#allocation8 + $0x10] sm:$0xff]  ;;  %v251_v16 = vld [vmem:[#allocation8] sm:$0xff] }
  0x37   :  { %412 = vmatprep.subr.mxu0 %v570_v0  ;;  %419 = vmatprep.subr.mxu1 %v570_v0  ;;  %v252_v15 = vld [vmem:[#allocation8 + $0x8] sm:$0xff]  ;;  %vm337_vm3 = vcmp.lt.s32.totalorder %v336_v23, 8  ;;  %vm341_vm4 = vcmp.ge.s32.totalorder %v336_v23, 16  ;;  %vm342_vm5 = vcmp.lt.s32.totalorder %v336_v23, 24  ;;  %vm338_vm7 = vcmp.ge.s32.totalorder %v336_v23, 8 }
  0x38   :  { %413 = vmatpush3.msra.mxu0 %v81_v2  ;;  %420 = vmatpush3.msra.mxu1 %v167_v5  ;;  %v393_v17 = vld [vmem:[%s657_s4] ss:$0 sm:$0xff]  ;;  %vm339_vm8 = vcmp.lt.s32.totalorder %v336_v23, 16  ;;  %vm343_vm9 = vmand %vm341_vm4, %vm342_vm5  ;;  %s572_s4 = smov [#allocation10]  }
  0x39   :  { %415 = vmatmul.mubr.msk.f32.vlgmr.msra.gmra.mxu0 %vm90_vm1, %v80_v3  ;;  %428 = vmatprep.subr.mxu0 %v570_v0  ;;  %v395_v24 = vld [vmem:[%s659_s6] ss:$0 sm:$0xff]  ;;  %vm340_vm10 = vmand %vm338_vm7, %vm339_vm8  ;;  %s380_s6 = sshll.u32 %s572_s4, 4  ;;  %s381_s6 = int_to_ptr.vmem [resolvable:$true] %s380_s6 }
  0x3a   :  { %436 = vmatprep.mubr.msk.f32.mxu0 %vm571_vm0, %v570_v0  ;;  %421 = vmatprep.subr.mxu1 %v570_v0  ;;  %s536_s24 = scalar_lea.vmem %s381_s6, 128  ;;  %p541_p7 = scmp.lt.s32.totalorder %s381_s6, %s381_s6 }
  0x3b   :  { %422 = vmatpush3.msra.mxu1 %v166_v6  ;;  %429 = vmatpush3.msra.mxu0 %v254_v8  ;;  %p537_p6 = scmp.ne.s32.totalorder %s381_s6, %s536_s24  ;;  %p542_p8 = scmp.lt.s32.totalorder %s536_s24, %s536_s24 }
  0x3c   :  { %423 = vmatprep.subr.mxu1 %v570_v0  ;;  %430 = vmatprep.subr.mxu0 %v570_v0 }
  0x3d   :  { %424 = vmatpush3.msra.mxu1 %v165_v7  ;;  %431 = vmatpush3.msra.mxu0 %v253_v14  ;;  %p543_p9 = por %p542_p8, %p541_p7 }
  0x3e   :  { %432 = vmatprep.subr.mxu0 %v570_v0 }
  0x3f   :  { %433 = vmatpush3.msra.mxu0 %v252_v15  ;;  %p544_p10 = pnand %p543_p9, %p537_p6 }
  0x40   :  { %434 = vmatprep.subr.mxu0 %v570_v0 }
  0x41   :  { %435 = vmatpush3.msra.mxu0 %v251_v16 }
  0xf9   :  { %v160_v10 = vpop.f32.mrf.mxu0 }
  0xfa   :  { %v161_v11 = vadd.f32 %v391_v9, %v160_v10 }
  0xfb   :  { %v416_v12 = vpop.f32.mrf.mxu0 }
  0xfc   :  { %v164_v13 = vmax.f32 %v161_v11, 0.0 }
  0xfe   :  { %426 = vmatmul.mubr.msk.f32.vlgmr.msra.gmra.mxu1 %vm176_vm2, %v164_v13 }
 0x1be   :  { %v246_v18 = vpop.f32.mrf.mxu1 }
 0x1bf   :  { %v247_v19 = vadd.f32 %v393_v17, %v246_v18 }
 0x1c0   :  { %v427_v20 = vpop.f32.mrf.mxu1 }
 0x1c1   :  { %v250_v21 = vmax.f32 %v247_v19, 0.0 }
 0x1c3   :  { %437 = vmatmul.mubr.msk.f32.vlgmr.msra.gmra.mxu0 %vm176_vm2, %v250_v21 }
 0x283   :  { %v331_v25 = vpop.f32.mrf.mxu0 }
 0x284   :  { %v332_v26 = vadd.f32 %v395_v24, %v331_v25 }
 0x285   :  { %v438_v27 = vpop.f32.mrf.mxu0 }
 0x286   :  { %v355_v28 = vand.u32 2147483647, %v332_v26  ;;  %v344_v29 = vsel %vm337_vm3, %v332_v26, -inf  ;;  %v354_v40 = vmax.f32 %v332_v26, 0.0 }
 0x287   :  { %345 = vmax.xlane.f32.xlu0 %v344_v29 }
 0x288   :  { %v356_v30 = vsub.f32 0.0, %v355_v28 }
 0x28a   :  { %v357_v31 = vmul.f32 1.442695, %v356_v30 }
 0x28c   :  { %448 = vpow2.f32 %v357_v31 }
 0x299   :  { %v449_v32 = vpop.eup %448 }
 0x29a   :  { %v359_v33 = vadd.f32 1.0, %v449_v32  ;;  %v362_v34 = vmul.f32 -0.5, %v449_v32  ;;  %v365_v36 = vand.u32 2147483647, %v449_v32 }
 0x29c   :  { %450 = vlog2.f32 %v359_v33  ;;  %v363_v35 = vadd.f32 1.0, %v362_v34  ;;  %vm366_vm6 = vcmp.lt.f32.partialorder %v365_v36, 0.0004427343 }
 0x29e   :  { %v364_v39 = vmul.f32 %v449_v32, %v363_v35 }
 0x2a9   :  { %v451_v37 = vpop.eup %450 }
 0x2aa   :  { %v361_v38 = vmul.f32 0.6931472, %v451_v37 }
 0x2ac   :  { %v367_v41 = vsel %vm366_vm6, %v364_v39, %v361_v38 }
 0x2ad   :  { %v368_v42 = vadd.f32 %v367_v41, %v354_v40 }
 0x2af   :  { %v369_v43 = vadd.f32 1e-05, %v368_v42 }
 0x2b1   :  { %v370_v44 = vsel %vm343_vm9, %v369_v43, 0.0 }
 0x2b2   :  { %v371_v45 = vsel %vm340_vm10, %v332_v26, %v370_v44 }
 0x310   :  { %v346_v46 = vpop.xlane.xlu0 %345 }
 0x311   :  { %v347_v47 = vsub.f32 %v344_v29, %v346_v46 }
 0x313   :  { %v348_v48 = vmul.f32 1.442695, %v347_v47 }
 0x315   :  { %452 = vpow2.f32 %v348_v48 }
 0x322   :  { %v453_v49 = vpop.eup %452 }
 0x323   :  { %350 = vadd.xlane.f32.xlu0 %v453_v49 }
 0x3ac   :  { %v351_v50 = vpop.xlane.xlu0 %350 }
 0x3ad   :  { %454 = vrcp.f32 %v351_v50 }
 0x3ba   :  { %v455_v51 = vpop.eup %454 }
 0x3bb   :  { %v353_v52 = vmul.f32 %v455_v51, %v453_v49 }
 0x3bd   :  { %v372_v53 = vsel %vm337_vm3, %v353_v52, %v371_v45 }
 0x3be   :  { %373 = vst [vmem:[#allocation10] sm:$0xff] %v372_v53 }
 0x3bf   :  { %547 = shalt.err (!%p544_p10)
}
 0x3c0   :  { %383 = dma.vmem_to_hbm [thread:$0]  %s381_s6, 128, %s660_s7, [#allocation4]  }
 0x3c1   :  { %562 = dma.done.wait [#allocation4], 128  }
 0x3c2   :  { %563 = vsyncadd [#allocation4], 4294967168 }
 0x3c3   :  { %387 = vsyncpa [#allocation3], 1 }
 0x3c4   :  { %388 = vsyncpa [#allocation6], 1 }
 0x3c5   :  { %389 = vsyncpa [#allocation9], 1 }
 0x3c6   :  { %390 = vsyncpa [#allocation4], 1 }

</bundles_post_ra>
